<compile_context>
chip_gen: v7x
topology: tpu7x:2x2x1
jax: 0.10.0
libtpu: 0.0.40
codegen_flags: <defaults>
</compile_context>

<pallas_src>
from functools import partial

import jax
import jax.numpy as jnp
from jax.experimental import pallas as pl
from jax.experimental.pallas import tpu as pltpu


def _round_up(x: int, m: int) -> int:
    return (x + m - 1) // m * m


def _leaky(x):
    # nn.LeakyReLU default negative_slope = 0.01
    return jnp.where(x >= 0, x, 0.01 * x)


# ----------------------------- Pallas kernel -------------------------------
def _company_mlp_kernel(x_ref, w1_ref, b1_ref, w2_ref, b2_ref, w3_ref, b3_ref,
                        o_ref, *, l2norm: bool):
    x = x_ref[...]                                           # [TM, Fp] f32

    if l2norm:
        # F.normalize(p=2, eps=1e-12): x / max(||x||, 1e-12) == x * rsqrt(max(ss, 1e-24))
        # (zero-padded lanes contribute 0 to the sum of squares, so this is exact).
        sumsq = jnp.sum(x * x, axis=-1, keepdims=True)
        x = x * jax.lax.rsqrt(jnp.maximum(sumsq, 1e-24))

    # Layer 1: [TM, Fp] @ [Fp, 256]  (bf16 operands, f32 accumulate)
    h = jnp.dot(x.astype(jnp.bfloat16), w1_ref[...],
                preferred_element_type=jnp.float32) + b1_ref[...]
    h = _leaky(h)

    # Layer 2: [TM, 256] @ [256, 128]
    h = jnp.dot(h.astype(jnp.bfloat16), w2_ref[...],
                preferred_element_type=jnp.float32) + b2_ref[...]
    h = _leaky(h)

    # Layer 3: [TM, 128] @ [128, Fo]  (Fo = fod zero-padded to 128 lanes)
    h = jnp.dot(h.astype(jnp.bfloat16), w3_ref[...],
                preferred_element_type=jnp.float32) + b3_ref[...]
    o_ref[...] = _leaky(h)


# ------------------------------ wrapper -------------------------------------
def company_mlp(feat_set, params, *, l2norm: bool = True, block_rows: int = 512):
    """feat_set: [B, K, fid] or [B, fid] float32.  Returns same leading shape with fod."""
    w1, b1, w2, b2, w3, b3 = params
    fid = w1.shape[0]
    fod = w3.shape[1]

    lead_shape = feat_set.shape[:-1]
    assert feat_set.shape[-1] == fid
    M = 1
    for d in lead_shape:
        M *= d

    # ---- wrapper-side layout plumbing: flatten rows, zero-pad lanes ----
    Fp = _round_up(fid, 128)             # padded input feature width
    Fo = _round_up(fod, 128)             # padded (lane-dense) output width
    TM = min(block_rows, _round_up(M, 8))
    Mp = _round_up(M, TM)

    x2 = feat_set.reshape(M, fid).astype(jnp.float32)
    x2 = jnp.pad(x2, ((0, Mp - M), (0, Fp - fid)))

    # weights stored [in, out]; pad to lane-friendly shapes, cast to bf16 for the MXU
    w1p = jnp.pad(w1, ((0, Fp - fid), (0, 0))).astype(jnp.bfloat16)       # [Fp, 256]
    w2p = w2.astype(jnp.bfloat16)                                          # [256, 128]
    w3p = jnp.pad(w3, ((0, 0), (0, Fo - fod))).astype(jnp.bfloat16)        # [128, Fo]
    b1p = b1.reshape(1, 256).astype(jnp.float32)
    b2p = b2.reshape(1, 128).astype(jnp.float32)
    b3p = jnp.pad(b3.reshape(1, fod), ((0, 0), (0, Fo - fod))).astype(jnp.float32)

    grid = (pl.cdiv(Mp, TM),)

    in_specs = [
        pl.BlockSpec((TM, Fp), lambda i: (i, 0)),     # x  : tiled over rows
        pl.BlockSpec((Fp, 256), lambda i: (0, 0)),    # w1 : VMEM-resident
        pl.BlockSpec((1, 256), lambda i: (0, 0)),     # b1
        pl.BlockSpec((256, 128), lambda i: (0, 0)),   # w2
        pl.BlockSpec((1, 128), lambda i: (0, 0)),     # b2
        pl.BlockSpec((128, Fo), lambda i: (0, 0)),    # w3
        pl.BlockSpec((1, Fo), lambda i: (0, 0)),      # b3
    ]
    out_specs = pl.BlockSpec((TM, Fo), lambda i: (i, 0))

    flops = 2 * Mp * (Fp * 256 + 256 * 128 + 128 * Fo)
    bytes_accessed = (Mp * Fp * 4 + Mp * Fo * 4
                      + (Fp * 256 + 256 * 128 + 128 * Fo) * 2
                      + (256 + 128 + Fo) * 4)
    cost = pl.CostEstimate(flops=flops, transcendentals=Mp,
                           bytes_accessed=bytes_accessed)

    out_padded = pl.pallas_call(
        partial(_company_mlp_kernel, l2norm=l2norm),
        out_shape=jax.ShapeDtypeStruct((Mp, Fo), jnp.float32),
        grid=grid,
        in_specs=in_specs,
        out_specs=out_specs,
        compiler_params=pltpu.CompilerParams(
            dimension_semantics=("parallel",),      # shard row-tiles across TCs on v7x
            vmem_limit_bytes=32 * 1024 * 1024,      # working set is < 3 MiB per step
        ),
        cost_estimate=cost,
    )(x2, w1p, b1p, w2p, b2p, w3p, b3p)

    out = out_padded[:M, :fod]
    return out.reshape(*lead_shape, fod)


# --------------------------- parameter init ---------------------------------
def init_params(key, fid=102, fod=64):
    """PyTorch nn.Linear init: U(-1/sqrt(fin), 1/sqrt(fin)); stored as [in, out]."""
    def lin(k, fin, fout):
        kw, kb = jax.random.split(k)
        s = 1.0 / jnp.sqrt(jnp.float32(fin))
        w = jax.random.uniform(kw, (fin, fout), jnp.float32, -s, s)
        b = jax.random.uniform(kb, (fout,), jnp.float32, -s, s)
        return w, b

    k1, k2, k3 = jax.random.split(key, 3)
    w1, b1 = lin(k1, fid, 256)
    w2, b2 = lin(k2, 256, 128)
    w3, b3 = lin(k3, 128, fod)
    return (w1, b1, w2, b2, w3, b3)


# ----------------------- pure-JAX reference (check) --------------------------
def company_mlp_ref(feat_set, params, l2norm=True):
    w1, b1, w2, b2, w3, b3 = params
    x = feat_set.astype(jnp.float32)
    if l2norm:
        nrm = jnp.sqrt(jnp.sum(x * x, axis=-1, keepdims=True))
        x = x / jnp.maximum(nrm, 1e-12)
    h = _leaky(x @ w1 + b1)
    h = _leaky(h @ w2 + b2)
    return _leaky(h @ w3 + b3)


if __name__ == "__main__":
    B, K, FID, FOD = 2, 8, 102, 64

    key = jax.random.PRNGKey(0)
    k_params, k_x3, k_x2 = jax.random.split(key, 3)

    params = init_params(k_params, FID, FOD)

    # ---- [B, K, fid] path (dim=2 normalize) ----
    feat_set = jax.random.normal(k_x3, (B, K, FID), jnp.float32)
    out3 = company_mlp(feat_set, params, l2norm=True)
    out3 = jax.block_until_ready(out3)
    ref3 = company_mlp_ref(feat_set, params, l2norm=True)
    assert out3.shape == (B, K, FOD)
    # kernel uses bf16 MXU operands (f32 accumulate), so tolerance is loosened vs f32 ref
    assert jnp.allclose(out3, ref3, atol=3e-2, rtol=3e-2), \
        f"3D mismatch, max abs err {jnp.max(jnp.abs(out3 - ref3))}"

    # ---- [B, fid] path (dim=1 normalize) ----
    feat_2d = jax.random.normal(k_x2, (B, FID), jnp.float32)
    out2 = company_mlp(feat_2d, params, l2norm=True)
    out2 = jax.block_until_ready(out2)
    ref2 = company_mlp_ref(feat_2d, params, l2norm=True)
    assert out2.shape == (B, FOD)
    assert jnp.allclose(out2, ref2, atol=3e-2, rtol=3e-2), \
        f"2D mismatch, max abs err {jnp.max(jnp.abs(out2 - ref2))}"

    print("KERNEL_OK")
</pallas_src>

<mosaic_0001>
module attributes {stable_mosaic.version = 11 : i64} {
  func.func @_company_mlp_kernel(%arg0: i32, %arg1: memref<16x128xf32, #tpu.memory_space<vmem>>, %arg2: memref<128x256xbf16, #tpu.memory_space<vmem>>, %arg3: memref<1x256xf32, #tpu.memory_space<vmem>>, %arg4: memref<256x128xbf16, #tpu.memory_space<vmem>>, %arg5: memref<1x128xf32, #tpu.memory_space<vmem>>, %arg6: memref<128x128xbf16, #tpu.memory_space<vmem>>, %arg7: memref<1x128xf32, #tpu.memory_space<vmem>>, %arg8: memref<16x128xf32, #tpu.memory_space<vmem>>) attributes {dimension_semantics = [#tpu.dimension_semantics<parallel>], iteration_bounds = array<i64: 1>, scalar_prefetch = 0 : i64, scratch_operands = 0 : i64, tpu.core_type = #tpu.core_type<tc>, window_params = [{transform_indices = @transform_0, window_bounds = array<i64: 16, 128>}, {pipeline_mode = #tpu.pipeline_mode<synchronous>, transform_indices = @transform_1, window_bounds = array<i64: 128, 256>}, {pipeline_mode = #tpu.pipeline_mode<synchronous>, transform_indices = @transform_2, window_bounds = array<i64: 1, 256>}, {pipeline_mode = #tpu.pipeline_mode<synchronous>, transform_indices = @transform_3, window_bounds = array<i64: 256, 128>}, {pipeline_mode = #tpu.pipeline_mode<synchronous>, transform_indices = @transform_4, window_bounds = array<i64: 1, 128>}, {pipeline_mode = #tpu.pipeline_mode<synchronous>, transform_indices = @transform_5, window_bounds = array<i64: 128, 128>}, {pipeline_mode = #tpu.pipeline_mode<synchronous>, transform_indices = @transform_6, window_bounds = array<i64: 1, 128>}, {transform_indices = @transform_7, window_bounds = array<i64: 16, 128>}]} {
    %c0 = arith.constant 0 : index
    %c0_0 = arith.constant 0 : index
    %0 = vector.load %arg1[%c0, %c0_0] : memref<16x128xf32, #tpu.memory_space<vmem>>, vector<16x128xf32>
    %1 = arith.mulf %0, %0 : vector<16x128xf32>
    %cst = arith.constant dense<0.000000e+00> : vector<16xf32>
    %2 = vector.multi_reduction <add>, %1, %cst [1] : vector<16x128xf32> to vector<16xf32>
    %3 = vector.shape_cast %2 : vector<16xf32> to vector<16x1xf32>
    %cst_1 = arith.constant 1.000000e-24 : f32
    %4 = vector.broadcast %cst_1 : f32 to vector<16x1xf32>
    %5 = arith.maximumf %3, %4 : vector<16x1xf32>
    %6 = math.rsqrt %5 : vector<16x1xf32>
    %7 = vector.broadcast %6 : vector<16x1xf32> to vector<16x128xf32>
    %8 = arith.mulf %0, %7 : vector<16x128xf32>
    %9 = arith.truncf %8 : vector<16x128xf32> to vector<16x128xbf16>
    %c0_2 = arith.constant 0 : index
    %c0_3 = arith.constant 0 : index
    %10 = vector.load %arg2[%c0_2, %c0_3] : memref<128x256xbf16, #tpu.memory_space<vmem>>, vector<128x256xbf16>
    %cst_4 = arith.constant dense<0.000000e+00> : vector<16x256xf32>
    %11 = tpu.matmul %9, %10, %cst_4 {dimension_numbers = #tpu.dot_dimension_numbers<[1], [0], [0], [1], [0, 0, 1, 1], [], []>} : vector<16x128xbf16>, vector<128x256xbf16>, vector<16x256xf32> -> vector<16x256xf32>
    %c0_5 = arith.constant 0 : index
    %c0_6 = arith.constant 0 : index
    %12 = vector.load %arg3[%c0_5, %c0_6] : memref<1x256xf32, #tpu.memory_space<vmem>>, vector<1x256xf32>
    %13 = vector.broadcast %12 : vector<1x256xf32> to vector<16x256xf32>
    %14 = arith.addf %11, %13 : vector<16x256xf32>
    %cst_7 = arith.constant 0.000000e+00 : f32
    %15 = vector.broadcast %cst_7 : f32 to vector<16x256xf32>
    %16 = arith.cmpf oge, %14, %15 : vector<16x256xf32>
    %cst_8 = arith.constant 0.00999999977 : f32
    %17 = vector.broadcast %cst_8 : f32 to vector<16x256xf32>
    %18 = arith.mulf %17, %14 : vector<16x256xf32>
    %19 = arith.select %16, %14, %18 : vector<16x256xi1>, vector<16x256xf32>
    %20 = arith.truncf %19 : vector<16x256xf32> to vector<16x256xbf16>
    %c0_9 = arith.constant 0 : index
    %c0_10 = arith.constant 0 : index
    %21 = vector.load %arg4[%c0_9, %c0_10] : memref<256x128xbf16, #tpu.memory_space<vmem>>, vector<256x128xbf16>
    %cst_11 = arith.constant dense<0.000000e+00> : vector<16x128xf32>
    %22 = tpu.matmul %20, %21, %cst_11 {dimension_numbers = #tpu.dot_dimension_numbers<[1], [0], [0], [1], [0, 0, 1, 1], [], []>} : vector<16x256xbf16>, vector<256x128xbf16>, vector<16x128xf32> -> vector<16x128xf32>
    %c0_12 = arith.constant 0 : index
    %c0_13 = arith.constant 0 : index
    %23 = vector.load %arg5[%c0_12, %c0_13] : memref<1x128xf32, #tpu.memory_space<vmem>>, vector<1x128xf32>
    %24 = vector.broadcast %23 : vector<1x128xf32> to vector<16x128xf32>
    %25 = arith.addf %22, %24 : vector<16x128xf32>
    %cst_14 = arith.constant 0.000000e+00 : f32
    %26 = vector.broadcast %cst_14 : f32 to vector<16x128xf32>
    %27 = arith.cmpf oge, %25, %26 : vector<16x128xf32>
    %cst_15 = arith.constant 0.00999999977 : f32
    %28 = vector.broadcast %cst_15 : f32 to vector<16x128xf32>
    %29 = arith.mulf %28, %25 : vector<16x128xf32>
    %30 = arith.select %27, %25, %29 : vector<16x128xi1>, vector<16x128xf32>
    %31 = arith.truncf %30 : vector<16x128xf32> to vector<16x128xbf16>
    %c0_16 = arith.constant 0 : index
    %c0_17 = arith.constant 0 : index
    %32 = vector.load %arg6[%c0_16, %c0_17] : memref<128x128xbf16, #tpu.memory_space<vmem>>, vector<128x128xbf16>
    %cst_18 = arith.constant dense<0.000000e+00> : vector<16x128xf32>
    %33 = tpu.matmul %31, %32, %cst_18 {dimension_numbers = #tpu.dot_dimension_numbers<[1], [0], [0], [1], [0, 0, 1, 1], [], []>} : vector<16x128xbf16>, vector<128x128xbf16>, vector<16x128xf32> -> vector<16x128xf32>
    %c0_19 = arith.constant 0 : index
    %c0_20 = arith.constant 0 : index
    %34 = vector.load %arg7[%c0_19, %c0_20] : memref<1x128xf32, #tpu.memory_space<vmem>>, vector<1x128xf32>
    %35 = vector.broadcast %34 : vector<1x128xf32> to vector<16x128xf32>
    %36 = arith.addf %33, %35 : vector<16x128xf32>
    %cst_21 = arith.constant 0.000000e+00 : f32
    %37 = vector.broadcast %cst_21 : f32 to vector<16x128xf32>
    %38 = arith.cmpf oge, %36, %37 : vector<16x128xf32>
    %cst_22 = arith.constant 0.00999999977 : f32
    %39 = vector.broadcast %cst_22 : f32 to vector<16x128xf32>
    %40 = arith.mulf %39, %36 : vector<16x128xf32>
    %41 = arith.select %38, %36, %40 : vector<16x128xi1>, vector<16x128xf32>
    %c0_23 = arith.constant 0 : index
    %c0_24 = arith.constant 0 : index
    %42 = vector.load %arg8[%c0_23, %c0_24] : memref<16x128xf32, #tpu.memory_space<vmem>>, vector<16x128xf32>
    tpu.vector_store %arg8[%c0_23, %c0_24], %41 {strides = array<i32>} : memref<16x128xf32, #tpu.memory_space<vmem>>, vector<16x128xf32>,
    return
  }
  func.func @transform_0(%arg0: i32) -> (i32, i32) {
    %c0_i32 = arith.constant 0 : i32
    %c0_i32_0 = arith.constant 0 : i32
    return %arg0, %c0_i32 : i32, i32
  }
  func.func @transform_1(%arg0: i32) -> (i32, i32) {
    %c0_i32 = arith.constant 0 : i32
    %c0_i32_0 = arith.constant 0 : i32
    %c0_i32_1 = arith.constant 0 : i32
    return %c0_i32, %c0_i32_0 : i32, i32
  }
  func.func @transform_2(%arg0: i32) -> (i32, i32) {
    %c0_i32 = arith.constant 0 : i32
    %c0_i32_0 = arith.constant 0 : i32
    %c0_i32_1 = arith.constant 0 : i32
    return %c0_i32, %c0_i32_0 : i32, i32
  }
  func.func @transform_3(%arg0: i32) -> (i32, i32) {
    %c0_i32 = arith.constant 0 : i32
    %c0_i32_0 = arith.constant 0 : i32
    %c0_i32_1 = arith.constant 0 : i32
    return %c0_i32, %c0_i32_0 : i32, i32
  }
  func.func @transform_4(%arg0: i32) -> (i32, i32) {
    %c0_i32 = arith.constant 0 : i32
    %c0_i32_0 = arith.constant 0 : i32
    %c0_i32_1 = arith.constant 0 : i32
    return %c0_i32, %c0_i32_0 : i32, i32
  }
  func.func @transform_5(%arg0: i32) -> (i32, i32) {
    %c0_i32 = arith.constant 0 : i32
    %c0_i32_0 = arith.constant 0 : i32
    %c0_i32_1 = arith.constant 0 : i32
    return %c0_i32, %c0_i32_0 : i32, i32
  }
  func.func @transform_6(%arg0: i32) -> (i32, i32) {
    %c0_i32 = arith.constant 0 : i32
    %c0_i32_0 = arith.constant 0 : i32
    %c0_i32_1 = arith.constant 0 : i32
    return %c0_i32, %c0_i32_0 : i32, i32
  }
  func.func @transform_7(%arg0: i32) -> (i32, i32) {
    %c0_i32 = arith.constant 0 : i32
    %c0_i32_0 = arith.constant 0 : i32
    return %arg0, %c0_i32 : i32, i32
  }
}

</mosaic_0001>

<bundles_post_ra>
// kernel: tpu_custom_call.1
= control target key start
LH: loop header
LB: loop body
LE: loop exit
PB: predicated region body
PF: predicated region fallthrough
CT: control target
= control target key end

     0   :  { %12 = vsyncpa [#allocation3], 0  ;;  %s1007_s0 = inlined_call_operand.hbm [shape: f32[16,128], index: 0, kind: input, shape index: {}]   ;;  %s1008_s1 = inlined_call_operand.hbm [shape: bf16[128,256], index: 1, kind: input, shape index: {}]   ;;  %s1009_s2 = inlined_call_operand.vmem [shape: f32[1,256], index: 2, kind: input, shape index: {}]   ;;  %s1010_s3 = inlined_call_operand.hbm [shape: bf16[256,128], index: 3, kind: input, shape index: {}]   ;;  %s1011_s4 = inlined_call_operand.vmem [shape: f32[1,128], index: 4, kind: input, shape index: {}]   ;;  %s1012_s5 = inlined_call_operand.hbm [shape: bf16[128,128], index: 5, kind: input, shape index: {}]   ;;  %s1013_s6 = inlined_call_operand.vmem [shape: f32[1,128], index: 6, kind: input, shape index: {}]   ;;  %s1014_s7 = inlined_call_operand.hbm [shape: f32[16,128], index: 7, kind: output, shape index: {}]  }
   0x1   :  { %13 = vsyncpa [#allocation6], 0 }
   0x2   :  { %14 = vsyncpa [#allocation9], 0 }
   0x3   :  { %15 = vsyncpa [#allocation4], 0  ;;  %s860_s24 = smov [#allocation5]   ;;  %s861_s26 = smov [#allocation2]  }
   0x4   :  { %s33_s25 = sshll.u32 %s860_s24, 4  ;;  %s21_s27 = sshll.u32 %s861_s26, 4  ;;  %s34_s25 = int_to_ptr.vmem [resolvable:$true] %s33_s25  ;;  %s912_s27 = int_to_ptr.vmem [resolvable:$true] %s21_s27 }
   0x5   :  { %s742_s30 = scalar_lea.hbm %s1008_s1, 2048 }
   0x6   :  { %p743_p0 = scmp.ne.s32.totalorder %s1008_s1, %s742_s30  ;;  %p746_p1 = scmp.lt.u32.totalorder %s742_s30, %s1008_s1 }
   0x8   :  { %p748_p2 = pnand %p746_p1, %p743_p0 }
   0xa   :  { %751 = shalt.err (!%p748_p2)
}
   0xb   :  { %s752_s12 = scalar_lea.vmem %s34_s25, 2048  ;;  %p757_p4 = scmp.lt.s32.totalorder %s34_s25, %s34_s25 }
   0xc   :  { %p753_p3 = scmp.ne.s32.totalorder %s34_s25, %s752_s12  ;;  %p758_p5 = scmp.lt.s32.totalorder %s752_s12, %s752_s12 }
   0xe   :  { %p759_p6 = por %p758_p5, %p757_p4 }
  0x10   :  { %p760_p7 = pnand %p759_p6, %p753_p3 }
  0x12   :  { %763 = shalt.err (!%p760_p7)
}
  0x13   :  { %s862_s13 = smov 128   ;;  %s863_s14 = smov 8  }
  0x14   :  { %39 = dma.hbm_to_vmem [thread:$0]  %s1008_s1, 2048, %s34_s25, [#allocation6], %s862_s13, %s862_s13, %s863_s14  }
  0x15   :  { %s764_s19 = scalar_lea.hbm %s1007_s0, 256 }
  0x16   :  { %p765_p8 = scmp.ne.s32.totalorder %s1007_s0, %s764_s19  ;;  %p768_p9 = scmp.lt.u32.totalorder %s764_s19, %s1007_s0 }
  0x18   :  { %p770_p10 = pnand %p768_p9, %p765_p8 }
  0x1a   :  { %773 = shalt.err (!%p770_p10)
}
  0x1b   :  { %s774_s24 = scalar_lea.vmem %s912_s27, 256  ;;  %p779_p12 = scmp.lt.s32.totalorder %s912_s27, %s912_s27 }
  0x1c   :  { %p775_p11 = scmp.ne.s32.totalorder %s912_s27, %s774_s24  ;;  %p780_p13 = scmp.lt.s32.totalorder %s774_s24, %s774_s24 }
  0x1e   :  { %p781_p0 = por %p780_p13, %p779_p12 }
  0x20   :  { %p782_p1 = pnand %p781_p0, %p775_p11 }
  0x22   :  { %785 = shalt.err (!%p782_p1)
}
  0x23   :  { %27 = dma.hbm_to_vmem [thread:$0]  %s1007_s0, 256, %s912_s27, [#allocation3], %s862_s13, %s862_s13, %s863_s14  }
  0x24   :  { %s864_s26 = smov [#allocation7]   ;;  %s786_s8 = scalar_lea.hbm %s1010_s3, 2048 }
  0x25   :  { %s47_s28 = sshll.u32 %s864_s26, 4  ;;  %p787_p2 = scmp.ne.s32.totalorder %s1010_s3, %s786_s8  ;;  %s48_s28 = int_to_ptr.vmem [resolvable:$true] %s47_s28 }
  0x26   :  { %p790_p3 = scmp.lt.u32.totalorder %s786_s8, %s1010_s3 }
  0x28   :  { %p792_p4 = pnand %p790_p3, %p787_p2 }
  0x2a   :  { %795 = shalt.err (!%p792_p4)
}
  0x2b   :  { %s796_s15 = scalar_lea.vmem %s48_s28, 2048  ;;  %p801_p6 = scmp.lt.s32.totalorder %s48_s28, %s48_s28 }
  0x2c   :  { %p797_p5 = scmp.ne.s32.totalorder %s48_s28, %s796_s15  ;;  %p802_p7 = scmp.lt.s32.totalorder %s796_s15, %s796_s15 }
  0x2e   :  { %p803_p8 = por %p802_p7, %p801_p6 }
  0x30   :  { %p804_p9 = pnand %p803_p8, %p797_p5 }
  0x32   :  { %807 = shalt.err (!%p804_p9)
}
  0x33   :  { %s865_s0 = smov 64   ;;  %s866_s27 = smov 4  }
  0x34   :  { %53 = dma.hbm_to_vmem [thread:$0]  %s1010_s3, 2048, %s48_s28, [#allocation6], %s865_s0, %s865_s0, %s866_s27  }
  0x35   :  { %s867_s18 = smov [#allocation8]   ;;  %s808_s22 = scalar_lea.hbm %s1012_s5, 1024 }
  0x36   :  { %s61_s19 = sshll.u32 %s867_s18, 4  ;;  %p809_p10 = scmp.ne.s32.totalorder %s1012_s5, %s808_s22  ;;  %s62_s19 = int_to_ptr.vmem [resolvable:$true] %s61_s19 }
  0x37   :  { %p812_p11 = scmp.lt.u32.totalorder %s808_s22, %s1012_s5 }
  0x39   :  { %p814_p12 = pnand %p812_p11, %p809_p10 }
  0x3b   :  { %817 = shalt.err (!%p814_p12)
}
  0x3c   :  { %s818_s26 = scalar_lea.vmem %s62_s19, 1024  ;;  %p823_p0 = scmp.lt.s32.totalorder %s62_s19, %s62_s19 }
  0x3d   :  { %p819_p13 = scmp.ne.s32.totalorder %s62_s19, %s818_s26  ;;  %p824_p1 = scmp.lt.s32.totalorder %s818_s26, %s818_s26 }
  0x3f   :  { %p825_p2 = por %p824_p1, %p823_p0 }
  0x41   :  { %p826_p3 = pnand %p825_p2, %p819_p13 }
  0x43   :  { %829 = shalt.err (!%p826_p3)
}
  0x44   :  { %67 = dma.hbm_to_vmem [thread:$0]  %s1012_s5, 1024, %s62_s19, [#allocation9], %s865_s0, %s865_s0, %s866_s27  }
  0x45   :  { %852 = dma.done.wait [#allocation3], 256  }
  0x46   :  { %853 = vsyncadd [#allocation3], 4294967040 }
  0x47   :  { %854 = dma.done.wait [#allocation6], 4096  }
  0x48   :  { %855 = vsyncadd [#allocation6], 4294963200 }
  0x49   :  { %856 = dma.done.wait [#allocation9], 1024  }
  0x4a   :  { %857 = vsyncadd [#allocation9], 4294966272  ;;  %v973_v0 = vld [vmem:[#allocation2] sm:$0xff]  ;;  %v975_v1 = vld [vmem:[#allocation2 + $0x8] sm:$0xff]  ;;  %v868_v17 = vmov 0   ;;  %v869_v47 = vmov 0.0   ;;  %v116_v52 = vlaneseq }
  0x4b   :  { %v85_v2 = vmul.f32 %v973_v0, %v973_v0  ;;  %v690_v3 = vld [vmem:[#allocation5 + $0x4] ss:$8 sps:$4 sm:$0xff]   ;;  %v692_v4 = vld [vmem:[#allocation5] ss:$8 sps:$4 sm:$0xff]   ;;  %v693_v5 = vld [vmem:[#allocation5 + $0x14] ss:$8 sps:$4 sm:$0xff]   ;;  %v86_v6 = vmul.f32 %v975_v1, %v975_v1  ;;  %238 = vmatprep.mubr.bf16.mxu0 %v868_v17 }
  0x4c   :  { %206 = vmatprep.subr.bf16.mxu0 %v690_v3  ;;  %v695_v7 = vld [vmem:[#allocation5 + $0x10] ss:$8 sps:$4 sm:$0xff]   ;;  %v696_v8 = vld [vmem:[#allocation5 + $0x24] ss:$8 sps:$4 sm:$0xff]   ;;  %v698_v9 = vld [vmem:[#allocation5 + $0x20] ss:$8 sps:$4 sm:$0xff]  }
  0x4d   :  { %87 = vadd.xlane.f32.xlu0 %v85_v2  ;;  %207 = vmatpush1.bf16.msra.mxu0 %v692_v4  ;;  %v699_v10 = vld [vmem:[#allocation5 + $0x34] ss:$8 sps:$4 sm:$0xff]   ;;  %v701_v11 = vld [vmem:[#allocation5 + $0x30] ss:$8 sps:$4 sm:$0xff]   ;;  %v702_v12 = vld [vmem:[#allocation5 + $0x44] ss:$8 sps:$4 sm:$0xff]  }
  0x4e   :  { %208 = vmatprep.subr.bf16.mxu0 %v693_v5  ;;  %v704_v13 = vld [vmem:[#allocation5 + $0x40] ss:$8 sps:$4 sm:$0xff]   ;;  %v705_v14 = vld [vmem:[#allocation5 + $0x54] ss:$8 sps:$4 sm:$0xff]   ;;  %v707_v15 = vld [vmem:[#allocation5 + $0x50] ss:$8 sps:$4 sm:$0xff]  }
  0x4f   :  { %v708_v16 = vld [vmem:[#allocation5 + $0x64] ss:$8 sps:$4 sm:$0xff]   ;;  %v710_v18 = vld [vmem:[#allocation5 + $0x60] ss:$8 sps:$4 sm:$0xff]   ;;  %v711_v19 = vld [vmem:[#allocation5 + $0x74] ss:$8 sps:$4 sm:$0xff]  }
  0x50   :  { %v713_v20 = vld [vmem:[#allocation5 + $0x70] ss:$8 sps:$4 sm:$0xff]   ;;  %v714_v21 = vld [vmem:[#allocation7 + $0x40] sm:$0xff]   ;;  %v716_v23 = vld [vmem:[#allocation7 + $0x48] sm:$0xff]   ;;  %v117_v53 = vshrl.u32 %v116_v52, 7  ;;  %vm870_vm4 = vmmov 0  }
  0x51   :  { %89 = vadd.xlane.f32.xlu0 %v86_v6  ;;  %209 = vmatpush1.bf16.msra.mxu0 %v695_v7  ;;  %v715_v22 = vld [vmem:[#allocation7] sm:$0xff]   ;;  %v717_v24 = vld [vmem:[#allocation7 + $0x8] sm:$0xff]   ;;  %v718_v25 = vld [vmem:[#allocation7 + $0x50] sm:$0xff]  }
  0x52   :  { %210 = vmatprep.subr.bf16.mxu0 %v696_v8  ;;  %627 = vmatprep.subr.bf16.mxu1 %v714_v21  ;;  %v719_v26 = vld [vmem:[#allocation7 + $0x10] sm:$0xff]   ;;  %v720_v27 = vld [vmem:[#allocation7 + $0x58] sm:$0xff]   ;;  %v722_v29 = vld [vmem:[#allocation7 + $0x60] sm:$0xff]   ;;  %v118_v54 = vsub.s32 0, %v117_v53  ;;  %v122_v56 = vsub.s32 1, %v117_v53 }
  0x53   :  { %628 = vmatpush3.bf16.msra.mxu1 %v715_v22  ;;  %v721_v28 = vld [vmem:[#allocation7 + $0x18] sm:$0xff]   ;;  %v723_v30 = vld [vmem:[#allocation7 + $0x20] sm:$0xff]   ;;  %v724_v40 = vld [vmem:[#allocation7 + $0x68] sm:$0xff]  }
  0x54   :  { %629 = vmatprep.subr.bf16.mxu1 %v716_v23  ;;  %v725_v41 = vld [vmem:[#allocation7 + $0x28] sm:$0xff]   ;;  %v726_v42 = vld [vmem:[#allocation7 + $0x70] sm:$0xff]   ;;  %v728_v44 = vld [vmem:[#allocation7 + $0x78] sm:$0xff]  }
  0x55   :  { %211 = vmatpush1.bf16.msra.mxu0 %v698_v9  ;;  %v727_v43 = vld [vmem:[#allocation7 + $0x30] sm:$0xff]   ;;  %v729_v45 = vld [vmem:[#allocation7 + $0x38] sm:$0xff]   ;;  %v730_v46 = vld [vmem:[#allocation8] sm:$0xff]  }
  0x56   :  { %212 = vmatprep.subr.bf16.mxu0 %v699_v10  ;;  %v731_v48 = vld [vmem:[#allocation8 + $0x8] sm:$0xff]   ;;  %v732_v49 = vld [vmem:[#allocation8 + $0x10] sm:$0xff]   ;;  %v733_v50 = vld [vmem:[#allocation8 + $0x18] sm:$0xff]  }
  0x57   :  { %630 = vmatpush3.bf16.msra.mxu1 %v717_v24  ;;  %v734_v51 = vld [vmem:[#allocation8 + $0x20] sm:$0xff]   ;;  %v114_v55 = vld [vmem:[%s1009_s2] sm:$0x3] }
  0x58   :  { %631 = vmatprep.subr.bf16.mxu1 %v718_v25  ;;  %v119_v57 = vrot.slane %v114_v55, %v118_v54  ;;  %v123_v58 = vrot.slane %v114_v55, %v122_v56  ;;  %v601_v17 = vld [vmem:[%s1011_s4] ss:$0 sm:$0xff]  ;;  %s871_s4 = smov [#allocation10]  }
  0x59   :  { %213 = vmatpush1.bf16.msra.mxu0 %v701_v11  ;;  %s571_s10 = sshll.u32 %s871_s4, 4  ;;  %s572_s10 = int_to_ptr.vmem [resolvable:$true] %s571_s10 }
  0x5a   :  { %214 = vmatprep.subr.bf16.mxu0 %v702_v12  ;;  %s830_s11 = scalar_lea.vmem %s572_s10, 256  ;;  %p835_p5 = scmp.lt.s32.totalorder %s572_s10, %s572_s10 }
  0x5b   :  { %632 = vmatpush3.bf16.msra.mxu1 %v719_v26  ;;  %p831_p4 = scmp.ne.s32.totalorder %s572_s10, %s830_s11  ;;  %p836_p6 = scmp.lt.s32.totalorder %s830_s11, %s830_s11 }
  0x5c   :  { %633 = vmatprep.subr.bf16.mxu1 %v720_v27 }
  0x5d   :  { %215 = vmatpush1.bf16.msra.mxu0 %v704_v13  ;;  %v735_v13 = vld [vmem:[#allocation8 + $0x28] sm:$0xff]   ;;  %p837_p7 = por %p836_p6, %p835_p5 }
  0x5e   :  { %216 = vmatprep.subr.bf16.mxu0 %v705_v14  ;;  %v736_v14 = vld [vmem:[#allocation8 + $0x30] sm:$0xff]  }
  0x5f   :  { %634 = vmatpush3.bf16.msra.mxu1 %v721_v28  ;;  %p838_p8 = pnand %p837_p7, %p831_p4 }
  0x60   :  { %635 = vmatprep.subr.bf16.mxu1 %v722_v29 }
  0x61   :  { %217 = vmatpush1.bf16.msra.mxu0 %v707_v15  ;;  %v737_v15 = vld [vmem:[#allocation8 + $0x38] sm:$0xff]  }
  0x62   :  { %218 = vmatprep.subr.bf16.mxu0 %v708_v16 }
  0x63   :  { %636 = vmatpush3.bf16.msra.mxu1 %v723_v30  ;;  %v618_v30 = vld [vmem:[%s1013_s6] ss:$0 sm:$0xff] }
  0x64   :  { %637 = vmatprep.subr.bf16.mxu1 %v724_v40 }
  0x65   :  { %219 = vmatpush1.bf16.msra.mxu0 %v710_v18 }
  0x66   :  { %220 = vmatprep.subr.bf16.mxu0 %v711_v19 }
  0x67   :  { %638 = vmatpush3.bf16.msra.mxu1 %v725_v41 }
  0x68   :  { %639 = vmatprep.subr.bf16.mxu1 %v726_v42 }
  0x69   :  { %221 = vmatpush1.bf16.msra.mxu0 %v713_v20 }
  0x6a   :  { %658 = vmatprep.subr.bf16.mxu0 %v869_v47 }
  0x6b   :  { %640 = vmatpush3.bf16.msra.mxu1 %v727_v43 }
  0x6c   :  { %641 = vmatprep.subr.bf16.mxu1 %v728_v44 }
  0x6f   :  { %642 = vmatpush3.bf16.msra.mxu1 %v729_v45 }
  0xda   :  { %v88_v31 = vpop.xlane.xlu0 %87 }
  0xdb   :  { %v91_v32 = vmax.f32 %v88_v31, 1e-24 }
  0xdd   :  { %738 = vrsqrt.f32 %v91_v32 }
  0xde   :  { %v90_v33 = vpop.xlane.xlu0 %89 }
  0xdf   :  { %v92_v34 = vmax.f32 %v90_v33, 1e-24 }
  0xe1   :  { %740 = vrsqrt.f32 %v92_v34 }
  0xe7   :  { %v739_v35 = vpop.eup %738 }
  0xe8   :  { %v95_v37 = vmul.f32 %v739_v35, %v973_v0 }
  0xeb   :  { %v741_v36 = vpop.eup %740 }
  0xec   :  { %v96_v38 = vmul.f32 %v741_v36, %v975_v1 }
  0xee   :  { %v97_v39 = vpack.c.bf16 %v96_v38, %v95_v37 }
  0xf0   :  { %239 = vmatmul.mubr.bf16.vlgmr.msra.gmra.mrb[0].mxu0 %v97_v39 }
  0xf1   :  { %659 = vmatpush3.bf16.msra.mxu0 %v730_v46  ;;  %674 = vmatprep.mubr.msk.bf16.mxu0 %vm870_vm4, %v869_v47 }
  0xf2   :  { %660 = vmatprep.subr.bf16.mxu0 %v869_v47 }
  0xf5   :  { %661 = vmatpush3.bf16.msra.mxu0 %v731_v48 }
  0xf6   :  { %662 = vmatprep.subr.bf16.mxu0 %v869_v47 }
  0xf9   :  { %663 = vmatpush3.bf16.msra.mxu0 %v732_v49 }
  0xfa   :  { %664 = vmatprep.subr.bf16.mxu0 %v869_v47 }
  0xfd   :  { %665 = vmatpush3.bf16.msra.mxu0 %v733_v50 }
  0xfe   :  { %666 = vmatprep.subr.bf16.mxu0 %v869_v47 }
 0x101   :  { %667 = vmatpush3.bf16.msra.mxu0 %v734_v51 }
 0x102   :  { %668 = vmatprep.subr.bf16.mxu0 %v869_v47 }
 0x105   :  { %669 = vmatpush3.bf16.msra.mxu0 %v735_v13 }
 0x106   :  { %670 = vmatprep.subr.bf16.mxu0 %v869_v47 }
 0x109   :  { %671 = vmatpush3.bf16.msra.mxu0 %v736_v14 }
 0x10a   :  { %672 = vmatprep.subr.bf16.mxu0 %v869_v47 }
 0x10d   :  { %673 = vmatpush3.bf16.msra.mxu0 %v737_v15 }
 0x1c3   :  { %v240_v59 = vpop.f32.mrb[0].mxu0 }
 0x1c4   :  { %v241_v60 = vadd.f32 %v240_v59, %v119_v57  ;;  %v242_v61 = vpop.f32.mrb[1].mxu0 }
 0x1c5   :  { %v243_v62 = vadd.f32 %v242_v61, %v123_v58  ;;  %v244_v63 = vpop.f32.mrb[2].mxu0 }
 0x1c6   :  { %v253_v0 = vmul.f32 0.01, %v241_v60  ;;  %v245_v1 = vadd.f32 %v244_v63, %v119_v57  ;;  %v246_v2 = vpop.f32.mrb[3].mxu0  ;;  %vm249_vm0 = vcmp.ge.f32.partialorder %v241_v60, 0.0 }
 0x1c7   :  { %v254_v3 = vmul.f32 0.01, %v243_v62  ;;  %v247_v4 = vadd.f32 %v246_v2, %v123_v58  ;;  %vm250_vm2 = vcmp.ge.f32.partialorder %v243_v62, 0.0 }
 0x1c8   :  { %vm251_vm1 = vcmp.ge.f32.partialorder %v245_v1, 0.0  ;;  %v255_v5 = vmul.f32 0.01, %v245_v1  ;;  %v257_v7 = vsel %vm249_vm0, %v241_v60, %v253_v0 }
 0x1c9   :  { %v256_v6 = vmul.f32 0.01, %v247_v4  ;;  %vm252_vm3 = vcmp.ge.f32.partialorder %v247_v4, 0.0  ;;  %v258_v9 = vsel %vm250_vm2, %v243_v62, %v254_v3 }
 0x1ca   :  { %v259_v8 = vsel %vm251_vm1, %v245_v1, %v255_v5 }
 0x1cb   :  { %v260_v10 = vsel %vm252_vm3, %v247_v4, %v256_v6  ;;  %v261_v11 = vpack.c.bf16 %v259_v8, %v257_v7 }
 0x1cc   :  { %v262_v12 = vpack.c.bf16 %v260_v10, %v258_v9 }
 0x1ce   :  { %430 = vmatprep.mubr.bf16.mxu1 %v262_v12 }
 0x1cf   :  { %431 = vmatmul.mubr.bf16.vlgmr.msra.gmra.mrb[0].mxu1 %v261_v11 }
 0x2a2   :  { %v643_v16 = vpop.f32.mrb[0].mxu1 }
 0x2a3   :  { %v644_v18 = vpop.f32.mrb[1].mxu1 }
 0x2a4   :  { %v645_v19 = vadd.f32 %v644_v18, %v643_v16  ;;  %v646_v20 = vpop.f32.mrb[2].mxu1 }
 0x2a5   :  { %v647_v21 = vpop.f32.mrb[3].mxu1 }
 0x2a6   :  { %v433_v22 = vadd.f32 %v645_v19, %v601_v17  ;;  %v648_v23 = vadd.f32 %v647_v21, %v646_v20 }
 0x2a8   :  { %v441_v24 = vmul.f32 0.01, %v433_v22  ;;  %v436_v25 = vadd.f32 %v648_v23, %v601_v17  ;;  %vm439_vm5 = vcmp.ge.f32.partialorder %v433_v22, 0.0 }
 0x2aa   :  { %vm440_vm6 = vcmp.ge.f32.partialorder %v436_v25, 0.0  ;;  %v442_v26 = vmul.f32 0.01, %v436_v25  ;;  %v443_v27 = vsel %vm439_vm5, %v433_v22, %v441_v24 }
 0x2ac   :  { %v444_v28 = vsel %vm440_vm6, %v436_v25, %v442_v26 }
 0x2ad   :  { %v445_v29 = vpack.c.bf16 %v444_v28, %v443_v27 }
 0x2af   :  { %675 = vmatmul.mubr.bf16.vlgmr.msra.gmra.mrb[4].mxu0 %v445_v29 }
 0x382   :  { %v551_v31 = vpop.f32.mrb[4].mxu0 }
 0x383   :  { %v552_v32 = vadd.f32 %v618_v30, %v551_v31  ;;  %v676_v33 = vpop.f32.mrb[5].mxu0 }
 0x384   :  { %v554_v34 = vpop.f32.mrb[6].mxu0 }
 0x385   :  { %vm558_vm7 = vcmp.ge.f32.partialorder %v552_v32, 0.0  ;;  %v560_v35 = vmul.f32 0.01, %v552_v32  ;;  %v555_v36 = vadd.f32 %v618_v30, %v554_v34  ;;  %v677_v37 = vpop.f32.mrb[7].mxu0 }
 0x387   :  { %vm559_vm8 = vcmp.ge.f32.partialorder %v555_v36, 0.0  ;;  %v561_v38 = vmul.f32 0.01, %v555_v36  ;;  %v562_v39 = vsel %vm558_vm7, %v552_v32, %v560_v35 }
 0x388   :  { %564 = vst [vmem:[#allocation10] sm:$0xff] %v562_v39 }
 0x389   :  { %v563_v40 = vsel %vm559_vm8, %v555_v36, %v561_v38 }
 0x38a   :  { %565 = vst [vmem:[#allocation10 + $0x8] sm:$0xff] %v563_v40 }
 0x38b   :  { %841 = shalt.err (!%p838_p8)
}
 0x38c   :  { %s842_s15 = scalar_lea.hbm %s1014_s7, 256 }
 0x38d   :  { %p843_p9 = scmp.ne.s32.totalorder %s1014_s7, %s842_s15  ;;  %p846_p10 = scmp.lt.u32.totalorder %s842_s15, %s1014_s7 }
 0x38f   :  { %p848_p11 = pnand %p846_p10, %p843_p9 }
 0x391   :  { %851 = shalt.err (!%p848_p11)
}
 0x392   :  { %577 = dma.vmem_to_hbm [thread:$0]  %s572_s10, 256, %s1014_s7, [#allocation4], %s862_s13, %s862_s13, %s863_s14  }
 0x393   :  { %858 = dma.done.wait [#allocation4], 256  }
 0x394   :  { %859 = vsyncadd [#allocation4], 4294967040 }
 0x395   :  { %581 = vsyncpa [#allocation3], 1 }
 0x396   :  { %582 = vsyncpa [#allocation6], 1 }
 0x397   :  { %583 = vsyncpa [#allocation9], 1 }
 0x398   :  { %584 = vsyncpa [#allocation4], 1 }

</bundles_post_ra>
